<compile_context>
chip_gen: v5e
topology: v5e:2x2
jax: 0.10.0
libtpu: 0.0.40
codegen_flags: <defaults>
</compile_context>

<pallas_src>
import math
import functools

import jax
import jax.numpy as jnp
from jax.experimental import pallas as pl
from jax.experimental.pallas import tpu as pltpu

HIDDEN = 256


def critic_kernel(s_ref, a_ref,
                  w14s_ref, w14a_ref, b14_ref,
                  w2_ref, b2_ref, w5_ref, b5_ref,
                  wout_ref, bout_ref,
                  q_ref):
    # ---- layer 1, both heads fused (B, 512); sa-concat replaced by two dots ----
    h = (jnp.dot(s_ref[...], w14s_ref[...], preferred_element_type=jnp.float32)
         + jnp.dot(a_ref[...], w14a_ref[...], preferred_element_type=jnp.float32)
         + b14_ref[...])
    h = jnp.maximum(h, 0.0)

    # split back into the two heads (lane-aligned: 256 is a multiple of 128)
    h1 = h[:, :HIDDEN]
    g1 = h[:, HIDDEN:]

    # ---- layer 2 per head ----
    h2 = jnp.maximum(
        jnp.dot(h1, w2_ref[...], preferred_element_type=jnp.float32) + b2_ref[...], 0.0)
    g2 = jnp.maximum(
        jnp.dot(g1, w5_ref[...], preferred_element_type=jnp.float32) + b5_ref[...], 0.0)

    # ---- combined output projection: block-diagonal (512, 2) -> (B, 2) ----
    hg = jnp.concatenate([h2, g2], axis=1)                       # (B, 512)
    q = jnp.dot(hg, wout_ref[...], preferred_element_type=jnp.float32) + bout_ref[...]
    q_ref[...] = q.astype(q_ref.dtype)


def critic_forward(state, action, params, *, block_b=512):
    """Pallas equivalent of Critic.forward: returns (q1, q2), each [B, 1]."""
    B, state_dim = state.shape
    f32 = jnp.float32

    # --- trace-time weight fusion (free, folded by XLA) ---
    w14 = jnp.concatenate([params["w1"], params["w4"]], axis=1)    # (D, 512)
    w14_s = w14[:state_dim]                                        # (state_dim, 512)
    w14_a = w14[state_dim:]                                        # (act_dim,   512)
    b14 = jnp.concatenate([params["b1"], params["b4"]], axis=1)    # (1, 512)

    zero = jnp.zeros((HIDDEN, 1), f32)
    w_out = jnp.concatenate(                                       # block-diag (512, 2)
        [jnp.concatenate([params["w3"], zero], axis=0),
         jnp.concatenate([zero, params["w6"]], axis=0)], axis=1)
    b_out = jnp.concatenate([params["b3"], params["b6"]], axis=1)  # (1, 2)
    # NOTE: on v6e/v7x, casting weights (and dot operands) to bf16 roughly doubles MXU
    # rate once the kernel is MXU-bound (large B); kept f32 here for exact reference parity.

    # --- batch tiling: pad to a multiple of 8, then of the batch tile ---
    pB = max(8, ((B + 7) // 8) * 8)
    tm = min(block_b, pB)
    pB = ((pB + tm - 1) // tm) * tm
    if pB != B:
        pad = pB - B
        state = jnp.pad(state, ((0, pad), (0, 0)))
        action = jnp.pad(action, ((0, pad), (0, 0)))
    grid = (pB // tm,)

    full = lambda arr: pl.BlockSpec(arr.shape, lambda i: (0, 0))      # VMEM-resident weight
    batch = lambda d: pl.BlockSpec((tm, d), lambda i: (i, 0))          # tiled over batch

    q = pl.pallas_call(
        critic_kernel,
        out_shape=jax.ShapeDtypeStruct((pB, 2), f32),
        grid=grid,
        in_specs=[
            batch(state.shape[1]),
            batch(action.shape[1]),
            full(w14_s), full(w14_a), full(b14),
            full(params["w2"]), full(params["b2"]),
            full(params["w5"]), full(params["b5"]),
            full(w_out), full(b_out),
        ],
        out_specs=pl.BlockSpec((tm, 2), lambda i: (i, 0)),
        compiler_params=pltpu.CompilerParams(
            dimension_semantics=("parallel",)),
    )(state, action, w14_s, w14_a, b14,
      params["w2"], params["b2"], params["w5"], params["b5"],
      w_out, b_out)

    return q[:B, 0:1], q[:B, 1:2]


def init_critic_params(key, state_dim, act_dim):
    """Deterministic init matching PyTorch nn.Linear default (Kaiming-uniform bound)."""
    d_in = state_dim + act_dim
    layer_dims = [(d_in, HIDDEN), (HIDDEN, HIDDEN), (HIDDEN, 1),
                  (d_in, HIDDEN), (HIDDEN, HIDDEN), (HIDDEN, 1)]
    params = {}
    for i, (fan_in, fan_out) in enumerate(layer_dims, start=1):
        key, kw, kb = jax.random.split(key, 3)
        bound = 1.0 / math.sqrt(fan_in)
        params[f"w{i}"] = jax.random.uniform(
            kw, (fan_in, fan_out), jnp.float32, minval=-bound, maxval=bound)
        params[f"b{i}"] = jax.random.uniform(
            kb, (1, fan_out), jnp.float32, minval=-bound, maxval=bound)
    return params


def _ref_forward(state, action, params):
    sa = jnp.concatenate([state, action], axis=1)

    def head(x, i0):
        h = jnp.maximum(x @ params[f"w{i0}"] + params[f"b{i0}"], 0.0)
        h = jnp.maximum(h @ params[f"w{i0 + 1}"] + params[f"b{i0 + 1}"], 0.0)
        return h @ params[f"w{i0 + 2}"] + params[f"b{i0 + 2}"]

    return head(sa, 1), head(sa, 4)


if __name__ == "__main__":
    state_dim, act_dim = 17, 6

    key = jax.random.PRNGKey(0)
    key, kp = jax.random.split(key)
    params = init_critic_params(kp, state_dim, act_dim)

    # Small smoke test (single grid step).
    key, ks, ka = jax.random.split(key, 3)
    state = jax.random.normal(ks, (8, state_dim), jnp.float32)
    action = jax.random.normal(ka, (8, act_dim), jnp.float32)
    q1, q2 = critic_forward(state, action, params)
    jax.block_until_ready((q1, q2))
    r1, r2 = _ref_forward(state, action, params)
    assert q1.shape == (8, 1) and q2.shape == (8, 1)
    assert jnp.allclose(q1, r1, atol=2e-4) and jnp.allclose(q2, r2, atol=2e-4)

    # Larger, non-aligned batch exercising the padded multi-step parallel grid.
    key, ks, ka = jax.random.split(key, 3)
    state = jax.random.normal(ks, (300, state_dim), jnp.float32)
    action = jax.random.normal(ka, (300, act_dim), jnp.float32)
    q1, q2 = critic_forward(state, action, params, block_b=128)
    jax.block_until_ready((q1, q2))
    r1, r2 = _ref_forward(state, action, params)
    assert q1.shape == (300, 1) and q2.shape == (300, 1)
    assert jnp.allclose(q1, r1, atol=2e-4) and jnp.allclose(q2, r2, atol=2e-4)

    print("KERNEL_OK")
</pallas_src>

<mosaic_0001>
module attributes {stable_mosaic.version = 11 : i64} {
  func.func @critic_kernel(%arg0: i32, %arg1: memref<8x17xf32, #tpu.memory_space<vmem>>, %arg2: memref<8x6xf32, #tpu.memory_space<vmem>>, %arg3: memref<17x512xf32, #tpu.memory_space<vmem>>, %arg4: memref<6x512xf32, #tpu.memory_space<vmem>>, %arg5: memref<1x512xf32, #tpu.memory_space<vmem>>, %arg6: memref<256x256xf32, #tpu.memory_space<vmem>>, %arg7: memref<1x256xf32, #tpu.memory_space<vmem>>, %arg8: memref<256x256xf32, #tpu.memory_space<vmem>>, %arg9: memref<1x256xf32, #tpu.memory_space<vmem>>, %arg10: memref<512x2xf32, #tpu.memory_space<vmem>>, %arg11: memref<1x2xf32, #tpu.memory_space<vmem>>, %arg12: memref<8x2xf32, #tpu.memory_space<vmem>>) attributes {dimension_semantics = [#tpu.dimension_semantics<parallel>], iteration_bounds = array<i64: 1>, scalar_prefetch = 0 : i64, scratch_operands = 0 : i64, tpu.core_type = #tpu.core_type<tc>, window_params = [{transform_indices = @transform_0, window_bounds = array<i64: 8, 17>}, {transform_indices = @transform_1, window_bounds = array<i64: 8, 6>}, {pipeline_mode = #tpu.pipeline_mode<synchronous>, transform_indices = @transform_2, window_bounds = array<i64: 17, 512>}, {pipeline_mode = #tpu.pipeline_mode<synchronous>, transform_indices = @transform_3, window_bounds = array<i64: 6, 512>}, {pipeline_mode = #tpu.pipeline_mode<synchronous>, transform_indices = @transform_4, window_bounds = array<i64: 1, 512>}, {pipeline_mode = #tpu.pipeline_mode<synchronous>, transform_indices = @transform_5, window_bounds = array<i64: 256, 256>}, {pipeline_mode = #tpu.pipeline_mode<synchronous>, transform_indices = @transform_6, window_bounds = array<i64: 1, 256>}, {pipeline_mode = #tpu.pipeline_mode<synchronous>, transform_indices = @transform_7, window_bounds = array<i64: 256, 256>}, {pipeline_mode = #tpu.pipeline_mode<synchronous>, transform_indices = @transform_8, window_bounds = array<i64: 1, 256>}, {pipeline_mode = #tpu.pipeline_mode<synchronous>, transform_indices = @transform_9, window_bounds = array<i64: 512, 2>}, {pipeline_mode = #tpu.pipeline_mode<synchronous>, transform_indices = @transform_10, window_bounds = array<i64: 1, 2>}, {transform_indices = @transform_11, window_bounds = array<i64: 8, 2>}]} {
    %c0 = arith.constant 0 : index
    %c0_0 = arith.constant 0 : index
    %0 = vector.load %arg1[%c0, %c0_0] : memref<8x17xf32, #tpu.memory_space<vmem>>, vector<8x17xf32>
    %c0_1 = arith.constant 0 : index
    %c0_2 = arith.constant 0 : index
    %1 = vector.load %arg3[%c0_1, %c0_2] : memref<17x512xf32, #tpu.memory_space<vmem>>, vector<17x512xf32>
    %cst = arith.constant dense<0.000000e+00> : vector<8x512xf32>
    %2 = tpu.matmul %0, %1, %cst {dimension_numbers = #tpu.dot_dimension_numbers<[1], [0], [0], [1], [0, 0, 1, 1], [], []>} : vector<8x17xf32>, vector<17x512xf32>, vector<8x512xf32> -> vector<8x512xf32>
    %c0_3 = arith.constant 0 : index
    %c0_4 = arith.constant 0 : index
    %3 = vector.load %arg2[%c0_3, %c0_4] : memref<8x6xf32, #tpu.memory_space<vmem>>, vector<8x6xf32>
    %c0_5 = arith.constant 0 : index
    %c0_6 = arith.constant 0 : index
    %4 = vector.load %arg4[%c0_5, %c0_6] : memref<6x512xf32, #tpu.memory_space<vmem>>, vector<6x512xf32>
    %cst_7 = arith.constant dense<0.000000e+00> : vector<8x512xf32>
    %5 = tpu.matmul %3, %4, %cst_7 {dimension_numbers = #tpu.dot_dimension_numbers<[1], [0], [0], [1], [0, 0, 1, 1], [], []>} : vector<8x6xf32>, vector<6x512xf32>, vector<8x512xf32> -> vector<8x512xf32>
    %6 = arith.addf %2, %5 : vector<8x512xf32>
    %c0_8 = arith.constant 0 : index
    %c0_9 = arith.constant 0 : index
    %7 = vector.load %arg5[%c0_8, %c0_9] : memref<1x512xf32, #tpu.memory_space<vmem>>, vector<1x512xf32>
    %8 = vector.broadcast %7 : vector<1x512xf32> to vector<8x512xf32>
    %9 = arith.addf %6, %8 : vector<8x512xf32>
    %cst_10 = arith.constant 0.000000e+00 : f32
    %10 = vector.broadcast %cst_10 : f32 to vector<8x512xf32>
    %11 = arith.maximumf %9, %10 : vector<8x512xf32>
    %12 = vector.extract_strided_slice %11 {offsets = [0, 0], sizes = [8, 256], strides = [1, 1]} : vector<8x512xf32> to vector<8x256xf32>
    %13 = vector.extract_strided_slice %11 {offsets = [0, 256], sizes = [8, 256], strides = [1, 1]} : vector<8x512xf32> to vector<8x256xf32>
    %c0_11 = arith.constant 0 : index
    %c0_12 = arith.constant 0 : index
    %14 = vector.load %arg6[%c0_11, %c0_12] : memref<256x256xf32, #tpu.memory_space<vmem>>, vector<256x256xf32>
    %cst_13 = arith.constant dense<0.000000e+00> : vector<8x256xf32>
    %15 = tpu.matmul %12, %14, %cst_13 {dimension_numbers = #tpu.dot_dimension_numbers<[1], [0], [0], [1], [0, 0, 1, 1], [], []>} : vector<8x256xf32>, vector<256x256xf32>, vector<8x256xf32> -> vector<8x256xf32>
    %c0_14 = arith.constant 0 : index
    %c0_15 = arith.constant 0 : index
    %16 = vector.load %arg7[%c0_14, %c0_15] : memref<1x256xf32, #tpu.memory_space<vmem>>, vector<1x256xf32>
    %17 = vector.broadcast %16 : vector<1x256xf32> to vector<8x256xf32>
    %18 = arith.addf %15, %17 : vector<8x256xf32>
    %cst_16 = arith.constant 0.000000e+00 : f32
    %19 = vector.broadcast %cst_16 : f32 to vector<8x256xf32>
    %20 = arith.maximumf %18, %19 : vector<8x256xf32>
    %c0_17 = arith.constant 0 : index
    %c0_18 = arith.constant 0 : index
    %21 = vector.load %arg8[%c0_17, %c0_18] : memref<256x256xf32, #tpu.memory_space<vmem>>, vector<256x256xf32>
    %cst_19 = arith.constant dense<0.000000e+00> : vector<8x256xf32>
    %22 = tpu.matmul %13, %21, %cst_19 {dimension_numbers = #tpu.dot_dimension_numbers<[1], [0], [0], [1], [0, 0, 1, 1], [], []>} : vector<8x256xf32>, vector<256x256xf32>, vector<8x256xf32> -> vector<8x256xf32>
    %c0_20 = arith.constant 0 : index
    %c0_21 = arith.constant 0 : index
    %23 = vector.load %arg9[%c0_20, %c0_21] : memref<1x256xf32, #tpu.memory_space<vmem>>, vector<1x256xf32>
    %24 = vector.broadcast %23 : vector<1x256xf32> to vector<8x256xf32>
    %25 = arith.addf %22, %24 : vector<8x256xf32>
    %cst_22 = arith.constant 0.000000e+00 : f32
    %26 = vector.broadcast %cst_22 : f32 to vector<8x256xf32>
    %27 = arith.maximumf %25, %26 : vector<8x256xf32>
    %28 = tpu.concatenate %20, %27 in 1 : vector<8x256xf32>, vector<8x256xf32> -> vector<8x512xf32>
    %c0_23 = arith.constant 0 : index
    %c0_24 = arith.constant 0 : index
    %29 = vector.load %arg10[%c0_23, %c0_24] : memref<512x2xf32, #tpu.memory_space<vmem>>, vector<512x2xf32>
    %cst_25 = arith.constant dense<0.000000e+00> : vector<8x2xf32>
    %30 = tpu.matmul %28, %29, %cst_25 {dimension_numbers = #tpu.dot_dimension_numbers<[1], [0], [0], [1], [0, 0, 1, 1], [], []>} : vector<8x512xf32>, vector<512x2xf32>, vector<8x2xf32> -> vector<8x2xf32>
    %c0_26 = arith.constant 0 : index
    %c0_27 = arith.constant 0 : index
    %31 = vector.load %arg11[%c0_26, %c0_27] : memref<1x2xf32, #tpu.memory_space<vmem>>, vector<1x2xf32>
    %32 = vector.broadcast %31 : vector<1x2xf32> to vector<8x2xf32>
    %33 = arith.addf %30, %32 : vector<8x2xf32>
    %c0_28 = arith.constant 0 : index
    %c0_29 = arith.constant 0 : index
    %34 = vector.load %arg12[%c0_28, %c0_29] : memref<8x2xf32, #tpu.memory_space<vmem>>, vector<8x2xf32>
    tpu.vector_store %arg12[%c0_28, %c0_29], %33 {strides = array<i32>} : memref<8x2xf32, #tpu.memory_space<vmem>>, vector<8x2xf32>,
    return
  }
  func.func @transform_0(%arg0: i32) -> (i32, i32) {
    %c0_i32 = arith.constant 0 : i32
    %c0_i32_0 = arith.constant 0 : i32
    return %arg0, %c0_i32 : i32, i32
  }
  func.func @transform_1(%arg0: i32) -> (i32, i32) {
    %c0_i32 = arith.constant 0 : i32
    %c0_i32_0 = arith.constant 0 : i32
    return %arg0, %c0_i32 : i32, i32
  }
  func.func @transform_2(%arg0: i32) -> (i32, i32) {
    %c0_i32 = arith.constant 0 : i32
    %c0_i32_0 = arith.constant 0 : i32
    %c0_i32_1 = arith.constant 0 : i32
    return %c0_i32, %c0_i32_0 : i32, i32
  }
  func.func @transform_3(%arg0: i32) -> (i32, i32) {
    %c0_i32 = arith.constant 0 : i32
    %c0_i32_0 = arith.constant 0 : i32
    %c0_i32_1 = arith.constant 0 : i32
    return %c0_i32, %c0_i32_0 : i32, i32
  }
  func.func @transform_4(%arg0: i32) -> (i32, i32) {
    %c0_i32 = arith.constant 0 : i32
    %c0_i32_0 = arith.constant 0 : i32
    %c0_i32_1 = arith.constant 0 : i32
    return %c0_i32, %c0_i32_0 : i32, i32
  }
  func.func @transform_5(%arg0: i32) -> (i32, i32) {
    %c0_i32 = arith.constant 0 : i32
    %c0_i32_0 = arith.constant 0 : i32
    %c0_i32_1 = arith.constant 0 : i32
    return %c0_i32, %c0_i32_0 : i32, i32
  }
  func.func @transform_6(%arg0: i32) -> (i32, i32) {
    %c0_i32 = arith.constant 0 : i32
    %c0_i32_0 = arith.constant 0 : i32
    %c0_i32_1 = arith.constant 0 : i32
    return %c0_i32, %c0_i32_0 : i32, i32
  }
  func.func @transform_7(%arg0: i32) -> (i32, i32) {
    %c0_i32 = arith.constant 0 : i32
    %c0_i32_0 = arith.constant 0 : i32
    %c0_i32_1 = arith.constant 0 : i32
    return %c0_i32, %c0_i32_0 : i32, i32
  }
  func.func @transform_8(%arg0: i32) -> (i32, i32) {
    %c0_i32 = arith.constant 0 : i32
    %c0_i32_0 = arith.constant 0 : i32
    %c0_i32_1 = arith.constant 0 : i32
    return %c0_i32, %c0_i32_0 : i32, i32
  }
  func.func @transform_9(%arg0: i32) -> (i32, i32) {
    %c0_i32 = arith.constant 0 : i32
    %c0_i32_0 = arith.constant 0 : i32
    %c0_i32_1 = arith.constant 0 : i32
    return %c0_i32, %c0_i32_0 : i32, i32
  }
  func.func @transform_10(%arg0: i32) -> (i32, i32) {
    %c0_i32 = arith.constant 0 : i32
    %c0_i32_0 = arith.constant 0 : i32
    %c0_i32_1 = arith.constant 0 : i32
    return %c0_i32, %c0_i32_0 : i32, i32
  }
  func.func @transform_11(%arg0: i32) -> (i32, i32) {
    %c0_i32 = arith.constant 0 : i32
    %c0_i32_0 = arith.constant 0 : i32
    return %arg0, %c0_i32 : i32, i32
  }
}

</mosaic_0001>

<bundles_post_ra>
// kernel: tpu_custom_call.1
= control target key start
LH: loop header
LB: loop body
LE: loop exit
PB: predicated region body
PF: predicated region fallthrough
CT: control target
= control target key end

     0   :  { %16 = vsyncpa [#allocation3], 0  ;;  %s1565_s0 = inlined_call_operand.vmem [shape: f32[8,17], index: 0, kind: input, shape index: {}]   ;;  %s1566_s1 = inlined_call_operand.hbm [shape: f32[8,6], index: 1, kind: input, shape index: {}]   ;;  %s1567_s2 = inlined_call_operand.hbm [shape: f32[17,512], index: 2, kind: input, shape index: {}]   ;;  %s1568_s3 = inlined_call_operand.hbm [shape: f32[6,512], index: 3, kind: input, shape index: {}]   ;;  %s1569_s4 = inlined_call_operand.hbm [shape: f32[1,512], index: 4, kind: input, shape index: {}]   ;;  %s1570_s5 = inlined_call_operand.vmem [shape: f32[256,256], index: 5, kind: input, shape index: {}]   ;;  %s1571_s6 = inlined_call_operand.hbm [shape: f32[1,256], index: 6, kind: input, shape index: {}]   ;;  %s1572_s7 = inlined_call_operand.hbm [shape: f32[256,256], index: 7, kind: input, shape index: {}]   ;;  %s1573_s8 = inlined_call_operand.hbm [shape: f32[1,256], index: 8, kind: input, shape index: {}]   ;;  %s1574_s9 = inlined_call_operand.vmem [shape: f32[512,2], index: 9, kind: input, shape index: {}]   ;;  %s1575_s10 = inlined_call_operand.hbm [shape: f32[1,2], index: 10, kind: input, shape index: {}]   ;;  %s1576_s11 = inlined_call_operand.vmem [shape: f32[8,2], index: 11, kind: output, shape index: {}]  }
   0x1   :  { %17 = vsyncpa [#allocation5], 0 }
   0x2   :  { %18 = vsyncpa [#allocation8], 0 }
   0x3   :  { %19 = vsyncpa [#allocation11], 0  ;;  %s38_s19 = sshll.u32 %s1567_s2, 4  ;;  %s39_s19 = int_to_ptr.hbm [resolvable:$true] %s38_s19 }
   0x4   :  { %20 = vsyncpa [#allocation14], 0  ;;  %s1075_s20 = smov [#allocation4]   ;;  %s63_s24 = sshll.u32 %s1569_s4, 4  ;;  %s64_s24 = int_to_ptr.hbm [resolvable:$true] %s63_s24 }
   0x5   :  { %s40_s21 = sshll.u32 %s1075_s20, 4  ;;  %s1076_s25 = smov 512   ;;  %s41_s21 = int_to_ptr.vmem [resolvable:$true] %s40_s21 }
   0x6   :  { %s1077_s26 = smov 32   ;;  %s1078_s27 = smov [#allocation7]  }
   0x7   :  { %46 = dma.hbm_to_vmem [thread:$0]  %s39_s19, 1536, %s41_s21, [#allocation5], %s1076_s25, %s1076_s25, %s1077_s26  }
   0x8   :  { %s65_s28 = sshll.u32 %s1078_s27, 4  ;;  %s86_s12 = sshll.u32 %s1572_s7, 4  ;;  %s66_s28 = int_to_ptr.vmem [resolvable:$true] %s65_s28  ;;  %s87_s12 = int_to_ptr.hbm [resolvable:$true] %s86_s12 }
   0x9   :  { %68 = dma.hbm_to_vmem [thread:$0]  %s64_s24, 64, %s66_s28, [#allocation8]  }
   0xa   :  { %s1079_s2 = smov [#allocation10]   ;;  %s28_s4 = sshll.u32 %s1566_s1, 4  ;;  %s29_s4 = int_to_ptr.hbm [resolvable:$true] %s28_s4 }
   0xb   :  { %s88_s13 = sshll.u32 %s1079_s2, 4  ;;  %s1080_s16 = smov 256   ;;  %s89_s13 = int_to_ptr.vmem [resolvable:$true] %s88_s13 }
   0xc   :  { %s1081_s17 = smov 16   ;;  %s1082_s18 = smov [#allocation2]  }
   0xd   :  { %94 = dma.hbm_to_vmem [thread:$0]  %s87_s12, 8192, %s89_s13, [#allocation11], %s1080_s16, %s1080_s16, %s1081_s17  }
   0xe   :  { %s30_s19 = sshll.u32 %s1082_s18, 4  ;;  %s52_s7 = sshll.u32 %s1568_s3, 4  ;;  %s31_s19 = int_to_ptr.vmem [resolvable:$true] %s30_s19  ;;  %s53_s7 = int_to_ptr.hbm [resolvable:$true] %s52_s7 }
   0xf   :  { %33 = dma.hbm_to_vmem [thread:$0]  %s29_s4, 128, %s31_s19, [#allocation3]  }
  0x10   :  { %s76_s24 = sshll.u32 %s1571_s6, 4  ;;  %s1083_s25 = smov [#allocation6]   ;;  %s77_s24 = int_to_ptr.hbm [resolvable:$true] %s76_s24 }
  0x11   :  { %s54_s26 = sshll.u32 %s1083_s25, 4  ;;  %s1084_s1 = smov [#allocation9]   ;;  %s55_s26 = int_to_ptr.vmem [resolvable:$true] %s54_s26 }
  0x12   :  { %57 = dma.hbm_to_vmem [thread:$0]  %s53_s7, 512, %s55_s26, [#allocation5]  }
  0x13   :  { %s78_s27 = sshll.u32 %s1084_s1, 4  ;;  %s100_s30 = sshll.u32 %s1573_s8, 4  ;;  %s79_s27 = int_to_ptr.vmem [resolvable:$true] %s78_s27  ;;  %s101_s30 = int_to_ptr.hbm [resolvable:$true] %s100_s30 }
  0x14   :  { %81 = dma.hbm_to_vmem [thread:$0]  %s77_s24, 32, %s79_s27, [#allocation8]  }
  0x15   :  { %s113_s2 = sshll.u32 %s1575_s10, 4  ;;  %s1085_s13 = smov [#allocation12]   ;;  %s114_s2 = int_to_ptr.hbm [resolvable:$true] %s113_s2 }
  0x16   :  { %s102_s6 = sshll.u32 %s1085_s13, 4  ;;  %s1086_s14 = smov [#allocation13]   ;;  %s103_s6 = int_to_ptr.vmem [resolvable:$true] %s102_s6 }
  0x17   :  { %105 = dma.hbm_to_vmem [thread:$0]  %s101_s30, 32, %s103_s6, [#allocation11]  }
  0x18   :  { %s115_s15 = sshll.u32 %s1086_s14, 4  ;;  %s116_s15 = int_to_ptr.vmem [resolvable:$true] %s115_s15 }
  0x19   :  { %118 = dma.hbm_to_vmem [thread:$0]  %s114_s2, 16, %s116_s15, [#allocation14]  }
  0x1a   :  { %1065 = dma.done.wait [#allocation3], 128  }
  0x1b   :  { %1066 = vsyncadd [#allocation3], 4294967168 }
  0x1c   :  { %1067 = dma.done.wait [#allocation5], 2048  }
  0x1d   :  { %1068 = vsyncadd [#allocation5], 4294965248 }
  0x1e   :  { %1069 = dma.done.wait [#allocation8], 96  }
  0x1f   :  { %1070 = vsyncadd [#allocation8], 4294967200 }
  0x20   :  { %1071 = dma.done.wait [#allocation11], 8224  }
  0x21   :  { %1072 = vsyncadd [#allocation11], 4294959072 }
  0x22   :  { %1073 = dma.done.wait [#allocation14], 16  }
  0x23   :  { %1074 = vsyncadd [#allocation14], 4294967280  ;;  %vm173_vm0 = vcmask 1045504   ;;  %vm169_vm1 = vcmask 48128   ;;  %v165_v0 = vld [vmem:[#allocation6] sm:$0x3f] }
  0x24   :  { %v166_v1 = vld [vmem:[#allocation6 + $0x8] sm:$0x3f]  ;;  %v167_v2 = vld [vmem:[#allocation6 + $0x10] sm:$0x3f]  ;;  %844 = vmatpush.msk.msra.mxu0 %vm173_vm0, %v165_v0  ;;  %v168_v3 = vld [vmem:[#allocation6 + $0x18] sm:$0x3f] }
  0x25   :  { %846 = vmatpush.msk.msra.mxu1 %vm173_vm0, %v166_v1  ;;  %v164_v4 = vld [vmem:[#allocation2] sm:$0xff]  ;;  %848 = vmatpush.msk.msra.mxu2 %vm173_vm0, %v167_v2  ;;  %v160_v5 = vld [vmem:[#allocation4 + $0x40] sm:$0x1]  ;;  %vm270_vm2 = vcmask 1040384   ;;  %v161_v6 = vld [vmem:[#allocation4 + $0x48] sm:$0x1] }
  0x26   :  { %850 = vmatpush.msk.msra.mxu3 %vm173_vm0, %v168_v3  ;;  %845 = vmatmul.msk.f32.vlgmr.msra.gmra.mxu0 %vm169_vm1, %v164_v4  ;;  %v162_v7 = vld [vmem:[#allocation4 + $0x50] sm:$0x1]  ;;  %v163_v8 = vld [vmem:[#allocation4 + $0x58] sm:$0x1]  ;;  %v156_v9 = vld [vmem:[#allocation4 + $0x20] sm:$0xff]  ;;  %vm266_vm3 = vcmask 138240  }
  0x27   :  { %847 = vmatmul.msk.f32.vlgmr.msra.gmra.mxu1 %vm169_vm1, %v164_v4  ;;  %849 = vmatmul.msk.f32.vlgmr.msra.gmra.mxu2 %vm169_vm1, %v164_v4  ;;  %v157_v10 = vld [vmem:[#allocation4 + $0x28] sm:$0xff]  ;;  %v158_v11 = vld [vmem:[#allocation4 + $0x30] sm:$0xff]  ;;  %v159_v12 = vld [vmem:[#allocation4 + $0x38] sm:$0xff]  ;;  %vm833_vm4 = vcmask 15360  }
  0x28   :  { %851 = vmatmul.msk.f32.vlgmr.msra.gmra.mxu3 %vm169_vm1, %v164_v4  ;;  %852 = vmatpush.msk.msrb.mxu0 %vm270_vm2, %v160_v5  ;;  %v152_v13 = vld [vmem:[#allocation4] sm:$0xff]  ;;  %v153_v14 = vld [vmem:[#allocation4 + $0x8] sm:$0xff]  ;;  %v154_v15 = vld [vmem:[#allocation4 + $0x10] sm:$0xff] }
  0x29   :  { %854 = vmatpush.msk.msrb.mxu1 %vm270_vm2, %v161_v6  ;;  %856 = vmatpush.msk.msrb.mxu2 %vm270_vm2, %v162_v7  ;;  %v155_v16 = vld [vmem:[#allocation4 + $0x18] sm:$0xff]  ;;  %v411_v18 = vld [vmem:[%s1570_s5 + $0xf0] sm:$0xff]  ;;  %v412_v20 = vld [vmem:[%s1570_s5 + $0xf8] sm:$0xff] }
  0x2a   :  { %858 = vmatpush.msk.msrb.mxu3 %vm270_vm2, %v163_v8  ;;  %297 = vmatpush.msrb.mxu0 %v156_v9  ;;  %v151_v17 = vld [vmem:[%s1565_s0] sm:$0xff]  ;;  %v443_v19 = vld [vmem:[%s1570_s5 + $0x1f0] sm:$0xff]  ;;  %v444_v21 = vld [vmem:[%s1570_s5 + $0x1f8] sm:$0xff] }
  0x2b   :  { %317 = vmatpush.msrb.mxu1 %v157_v10  ;;  %337 = vmatpush.msrb.mxu2 %v158_v11  ;;  %v409_v22 = vld [vmem:[%s1570_s5 + $0xe0] sm:$0xff]  ;;  %v410_v24 = vld [vmem:[%s1570_s5 + $0xe8] sm:$0xff]  ;;  %v407_v26 = vld [vmem:[%s1570_s5 + $0xd0] sm:$0xff] }
  0x2c   :  { %357 = vmatpush.msrb.mxu3 %v159_v12  ;;  %298 = vmatpush.msrb.mxu0 %v152_v13  ;;  %v441_v23 = vld [vmem:[%s1570_s5 + $0x1e0] sm:$0xff]  ;;  %v442_v25 = vld [vmem:[%s1570_s5 + $0x1e8] sm:$0xff]  ;;  %v439_v27 = vld [vmem:[%s1570_s5 + $0x1d0] sm:$0xff] }
  0x2d   :  { %318 = vmatpush.msrb.mxu1 %v153_v14  ;;  %338 = vmatpush.msrb.mxu2 %v154_v15  ;;  %v408_v28 = vld [vmem:[%s1570_s5 + $0xd8] sm:$0xff]  ;;  %v405_v30 = vld [vmem:[%s1570_s5 + $0xc0] sm:$0xff]  ;;  %v406_v32 = vld [vmem:[%s1570_s5 + $0xc8] sm:$0xff] }
  0x2e   :  { %358 = vmatpush.msrb.mxu3 %v155_v16  ;;  %853 = vmatmul.msk.f32.vlgmr.msrb.gmra.mxu0 %vm266_vm3, %v151_v17  ;;  %v440_v29 = vld [vmem:[%s1570_s5 + $0x1d8] sm:$0xff]  ;;  %v437_v31 = vld [vmem:[%s1570_s5 + $0x1c0] sm:$0xff]  ;;  %v438_v33 = vld [vmem:[%s1570_s5 + $0x1c8] sm:$0xff] }
  0x2f   :  { %855 = vmatmul.msk.f32.vlgmr.msrb.gmra.mxu1 %vm266_vm3, %v151_v17  ;;  %857 = vmatmul.msk.f32.vlgmr.msrb.gmra.mxu2 %vm266_vm3, %v151_v17  ;;  %v403_v34 = vld [vmem:[%s1570_s5 + $0xb0] sm:$0xff]  ;;  %v404_v36 = vld [vmem:[%s1570_s5 + $0xb8] sm:$0xff]  ;;  %v401_v38 = vld [vmem:[%s1570_s5 + $0xa0] sm:$0xff] }
  0x30   :  { %859 = vmatmul.msk.f32.vlgmr.msrb.gmra.mxu3 %vm266_vm3, %v151_v17  ;;  %451 = vmatpush.msra.mxu0 %v411_v18  ;;  %v435_v35 = vld [vmem:[%s1570_s5 + $0x1b0] sm:$0xff]  ;;  %v436_v37 = vld [vmem:[%s1570_s5 + $0x1b8] sm:$0xff]  ;;  %v433_v39 = vld [vmem:[%s1570_s5 + $0x1a0] sm:$0xff] }
  0x31   :  { %471 = vmatpush.msra.mxu1 %v443_v19  ;;  %491 = vmatpush.msra.mxu2 %v412_v20  ;;  %v402_v40 = vld [vmem:[%s1570_s5 + $0xa8] sm:$0xff]  ;;  %v399_v42 = vld [vmem:[%s1570_s5 + $0x90] sm:$0xff]  ;;  %v400_v44 = vld [vmem:[%s1570_s5 + $0x98] sm:$0xff] }
  0x32   :  { %511 = vmatpush.msra.mxu3 %v444_v21  ;;  %452 = vmatpush.msra.mxu0 %v409_v22  ;;  %v434_v41 = vld [vmem:[%s1570_s5 + $0x1a8] sm:$0xff]  ;;  %v431_v43 = vld [vmem:[%s1570_s5 + $0x190] sm:$0xff]  ;;  %v432_v45 = vld [vmem:[%s1570_s5 + $0x198] sm:$0xff] }
  0x33   :  { %472 = vmatpush.msra.mxu1 %v441_v23  ;;  %492 = vmatpush.msra.mxu2 %v410_v24  ;;  %v397_v46 = vld [vmem:[%s1570_s5 + $0x80] sm:$0xff]  ;;  %v398_v48 = vld [vmem:[%s1570_s5 + $0x88] sm:$0xff]  ;;  %v395_v50 = vld [vmem:[%s1570_s5 + $0x70] sm:$0xff] }
  0x34   :  { %512 = vmatpush.msra.mxu3 %v442_v25  ;;  %453 = vmatpush.msra.mxu0 %v407_v26  ;;  %v429_v47 = vld [vmem:[%s1570_s5 + $0x180] sm:$0xff]  ;;  %v430_v49 = vld [vmem:[%s1570_s5 + $0x188] sm:$0xff]  ;;  %v427_v51 = vld [vmem:[%s1570_s5 + $0x170] sm:$0xff] }
  0x35   :  { %473 = vmatpush.msra.mxu1 %v439_v27  ;;  %493 = vmatpush.msra.mxu2 %v408_v28  ;;  %v396_v52 = vld [vmem:[%s1570_s5 + $0x78] sm:$0xff]  ;;  %v393_v54 = vld [vmem:[%s1570_s5 + $0x60] sm:$0xff]  ;;  %v394_v56 = vld [vmem:[%s1570_s5 + $0x68] sm:$0xff] }
  0x36   :  { %513 = vmatpush.msra.mxu3 %v440_v29  ;;  %454 = vmatpush.msra.mxu0 %v405_v30  ;;  %v428_v53 = vld [vmem:[%s1570_s5 + $0x178] sm:$0xff]  ;;  %v425_v55 = vld [vmem:[%s1570_s5 + $0x160] sm:$0xff]  ;;  %v426_v57 = vld [vmem:[%s1570_s5 + $0x168] sm:$0xff] }
  0x37   :  { %474 = vmatpush.msra.mxu1 %v437_v31  ;;  %494 = vmatpush.msra.mxu2 %v406_v32  ;;  %v391_v58 = vld [vmem:[%s1570_s5 + $0x50] sm:$0xff]  ;;  %v392_v60 = vld [vmem:[%s1570_s5 + $0x58] sm:$0xff]  ;;  %v389_v62 = vld [vmem:[%s1570_s5 + $0x40] sm:$0xff] }
  0x38   :  { %514 = vmatpush.msra.mxu3 %v438_v33  ;;  %455 = vmatpush.msra.mxu0 %v403_v34  ;;  %v423_v59 = vld [vmem:[%s1570_s5 + $0x150] sm:$0xff]  ;;  %v424_v61 = vld [vmem:[%s1570_s5 + $0x158] sm:$0xff]  ;;  %v421_v63 = vld [vmem:[%s1570_s5 + $0x140] sm:$0xff] }
  0x39   :  { %475 = vmatpush.msra.mxu1 %v435_v35  ;;  %495 = vmatpush.msra.mxu2 %v404_v36  ;;  %v390_v0 = vld [vmem:[%s1570_s5 + $0x48] sm:$0xff]  ;;  %v387_v2 = vld [vmem:[%s1570_s5 + $0x30] sm:$0xff]  ;;  %v388_v4 = vld [vmem:[%s1570_s5 + $0x38] sm:$0xff] }
  0x3a   :  { %515 = vmatpush.msra.mxu3 %v436_v37  ;;  %456 = vmatpush.msra.mxu0 %v401_v38  ;;  %v422_v1 = vld [vmem:[%s1570_s5 + $0x148] sm:$0xff]  ;;  %v419_v3 = vld [vmem:[%s1570_s5 + $0x130] sm:$0xff]  ;;  %v420_v5 = vld [vmem:[%s1570_s5 + $0x138] sm:$0xff] }
  0x3b   :  { %476 = vmatpush.msra.mxu1 %v433_v39  ;;  %496 = vmatpush.msra.mxu2 %v402_v40  ;;  %v385_v6 = vld [vmem:[%s1570_s5 + $0x20] sm:$0xff]  ;;  %v386_v8 = vld [vmem:[%s1570_s5 + $0x28] sm:$0xff]  ;;  %v383_v10 = vld [vmem:[%s1570_s5 + $0x10] sm:$0xff] }
  0x3c   :  { %516 = vmatpush.msra.mxu3 %v434_v41  ;;  %457 = vmatpush.msra.mxu0 %v399_v42  ;;  %v417_v7 = vld [vmem:[%s1570_s5 + $0x120] sm:$0xff]  ;;  %v418_v9 = vld [vmem:[%s1570_s5 + $0x128] sm:$0xff]  ;;  %v415_v11 = vld [vmem:[%s1570_s5 + $0x110] sm:$0xff] }
  0x3d   :  { %477 = vmatpush.msra.mxu1 %v431_v43  ;;  %497 = vmatpush.msra.mxu2 %v400_v44  ;;  %v384_v12 = vld [vmem:[%s1570_s5 + $0x18] sm:$0xff]  ;;  %v381_v14 = vld [vmem:[%s1570_s5] sm:$0xff]  ;;  %v382_v16 = vld [vmem:[%s1570_s5 + $0x8] sm:$0xff] }
  0x3e   :  { %517 = vmatpush.msra.mxu3 %v432_v45  ;;  %458 = vmatpush.msra.mxu0 %v397_v46  ;;  %v416_v13 = vld [vmem:[%s1570_s5 + $0x118] sm:$0xff]  ;;  %v413_v15 = vld [vmem:[%s1570_s5 + $0x100] sm:$0xff]  ;;  %v414_v17 = vld [vmem:[%s1570_s5 + $0x108] sm:$0xff] }
  0x3f   :  { %478 = vmatpush.msra.mxu1 %v429_v47  ;;  %498 = vmatpush.msra.mxu2 %v398_v48  ;;  %v563_v18 = vld [vmem:[#allocation10 + $0xf0] sm:$0xff]  ;;  %v564_v20 = vld [vmem:[#allocation10 + $0xf8] sm:$0xff]  ;;  %v561_v22 = vld [vmem:[#allocation10 + $0xe0] sm:$0xff] }
  0x40   :  { %518 = vmatpush.msra.mxu3 %v430_v49  ;;  %459 = vmatpush.msra.mxu0 %v395_v50  ;;  %v595_v19 = vld [vmem:[#allocation10 + $0x1f0] sm:$0xff]  ;;  %v596_v21 = vld [vmem:[#allocation10 + $0x1f8] sm:$0xff]  ;;  %v593_v23 = vld [vmem:[#allocation10 + $0x1e0] sm:$0xff] }
  0x41   :  { %479 = vmatpush.msra.mxu1 %v427_v51  ;;  %499 = vmatpush.msra.mxu2 %v396_v52  ;;  %v562_v24 = vld [vmem:[#allocation10 + $0xe8] sm:$0xff]  ;;  %v559_v26 = vld [vmem:[#allocation10 + $0xd0] sm:$0xff]  ;;  %v560_v28 = vld [vmem:[#allocation10 + $0xd8] sm:$0xff] }
  0x42   :  { %519 = vmatpush.msra.mxu3 %v428_v53  ;;  %460 = vmatpush.msra.mxu0 %v393_v54  ;;  %v594_v25 = vld [vmem:[#allocation10 + $0x1e8] sm:$0xff]  ;;  %v591_v27 = vld [vmem:[#allocation10 + $0x1d0] sm:$0xff]  ;;  %v592_v29 = vld [vmem:[#allocation10 + $0x1d8] sm:$0xff] }
  0x43   :  { %480 = vmatpush.msra.mxu1 %v425_v55  ;;  %500 = vmatpush.msra.mxu2 %v394_v56  ;;  %v557_v30 = vld [vmem:[#allocation10 + $0xc0] sm:$0xff]  ;;  %v558_v32 = vld [vmem:[#allocation10 + $0xc8] sm:$0xff]  ;;  %v555_v34 = vld [vmem:[#allocation10 + $0xb0] sm:$0xff] }
  0x44   :  { %520 = vmatpush.msra.mxu3 %v426_v57  ;;  %461 = vmatpush.msra.mxu0 %v391_v58  ;;  %v589_v31 = vld [vmem:[#allocation10 + $0x1c0] sm:$0xff]  ;;  %v590_v33 = vld [vmem:[#allocation10 + $0x1c8] sm:$0xff]  ;;  %v587_v35 = vld [vmem:[#allocation10 + $0x1b0] sm:$0xff] }
  0x45   :  { %481 = vmatpush.msra.mxu1 %v423_v59  ;;  %501 = vmatpush.msra.mxu2 %v392_v60  ;;  %v556_v36 = vld [vmem:[#allocation10 + $0xb8] sm:$0xff]  ;;  %v553_v38 = vld [vmem:[#allocation10 + $0xa0] sm:$0xff]  ;;  %v554_v40 = vld [vmem:[#allocation10 + $0xa8] sm:$0xff] }
  0x46   :  { %521 = vmatpush.msra.mxu3 %v424_v61  ;;  %462 = vmatpush.msra.mxu0 %v389_v62  ;;  %v588_v37 = vld [vmem:[#allocation10 + $0x1b8] sm:$0xff]  ;;  %v585_v39 = vld [vmem:[#allocation10 + $0x1a0] sm:$0xff]  ;;  %v586_v41 = vld [vmem:[#allocation10 + $0x1a8] sm:$0xff] }
  0x47   :  { %482 = vmatpush.msra.mxu1 %v421_v63  ;;  %502 = vmatpush.msra.mxu2 %v390_v0  ;;  %v551_v42 = vld [vmem:[#allocation10 + $0x90] sm:$0xff]  ;;  %v552_v44 = vld [vmem:[#allocation10 + $0x98] sm:$0xff]  ;;  %v549_v46 = vld [vmem:[#allocation10 + $0x80] sm:$0xff] }
  0x48   :  { %522 = vmatpush.msra.mxu3 %v422_v1  ;;  %463 = vmatpush.msra.mxu0 %v387_v2  ;;  %v583_v43 = vld [vmem:[#allocation10 + $0x190] sm:$0xff]  ;;  %v584_v45 = vld [vmem:[#allocation10 + $0x198] sm:$0xff]  ;;  %v581_v47 = vld [vmem:[#allocation10 + $0x180] sm:$0xff] }
  0x49   :  { %483 = vmatpush.msra.mxu1 %v419_v3  ;;  %503 = vmatpush.msra.mxu2 %v388_v4  ;;  %v550_v48 = vld [vmem:[#allocation10 + $0x88] sm:$0xff]  ;;  %v547_v50 = vld [vmem:[#allocation10 + $0x70] sm:$0xff]  ;;  %v548_v52 = vld [vmem:[#allocation10 + $0x78] sm:$0xff] }
  0x4a   :  { %523 = vmatpush.msra.mxu3 %v420_v5  ;;  %464 = vmatpush.msra.mxu0 %v385_v6  ;;  %v582_v49 = vld [vmem:[#allocation10 + $0x188] sm:$0xff]  ;;  %v579_v51 = vld [vmem:[#allocation10 + $0x170] sm:$0xff]  ;;  %v580_v53 = vld [vmem:[#allocation10 + $0x178] sm:$0xff] }
  0x4b   :  { %484 = vmatpush.msra.mxu1 %v417_v7  ;;  %504 = vmatpush.msra.mxu2 %v386_v8  ;;  %v545_v54 = vld [vmem:[#allocation10 + $0x60] sm:$0xff]  ;;  %v546_v56 = vld [vmem:[#allocation10 + $0x68] sm:$0xff]  ;;  %v543_v58 = vld [vmem:[#allocation10 + $0x50] sm:$0xff] }
  0x4c   :  { %524 = vmatpush.msra.mxu3 %v418_v9  ;;  %465 = vmatpush.msra.mxu0 %v383_v10  ;;  %v577_v55 = vld [vmem:[#allocation10 + $0x160] sm:$0xff]  ;;  %v578_v57 = vld [vmem:[#allocation10 + $0x168] sm:$0xff]  ;;  %v575_v59 = vld [vmem:[#allocation10 + $0x150] sm:$0xff] }
  0x4d   :  { %485 = vmatpush.msra.mxu1 %v415_v11  ;;  %505 = vmatpush.msra.mxu2 %v384_v12  ;;  %v544_v60 = vld [vmem:[#allocation10 + $0x58] sm:$0xff]  ;;  %v541_v62 = vld [vmem:[#allocation10 + $0x40] sm:$0xff]  ;;  %v542_v0 = vld [vmem:[#allocation10 + $0x48] sm:$0xff] }
  0x4e   :  { %525 = vmatpush.msra.mxu3 %v416_v13  ;;  %466 = vmatpush.msra.mxu0 %v381_v14  ;;  %v576_v61 = vld [vmem:[#allocation10 + $0x158] sm:$0xff]  ;;  %v573_v63 = vld [vmem:[#allocation10 + $0x140] sm:$0xff]  ;;  %v574_v1 = vld [vmem:[#allocation10 + $0x148] sm:$0xff] }
  0x4f   :  { %486 = vmatpush.msra.mxu1 %v413_v15  ;;  %506 = vmatpush.msra.mxu2 %v382_v16  ;;  %v539_v2 = vld [vmem:[#allocation10 + $0x30] sm:$0xff]  ;;  %v540_v4 = vld [vmem:[#allocation10 + $0x38] sm:$0xff]  ;;  %v537_v6 = vld [vmem:[#allocation10 + $0x20] sm:$0xff] }
  0x50   :  { %526 = vmatpush.msra.mxu3 %v414_v17  ;;  %603 = vmatpush.msrb.mxu0 %v563_v18  ;;  %v571_v3 = vld [vmem:[#allocation10 + $0x130] sm:$0xff]  ;;  %v572_v5 = vld [vmem:[#allocation10 + $0x138] sm:$0xff]  ;;  %v569_v7 = vld [vmem:[#allocation10 + $0x120] sm:$0xff] }
  0x51   :  { %623 = vmatpush.msrb.mxu1 %v595_v19  ;;  %643 = vmatpush.msrb.mxu2 %v564_v20  ;;  %v538_v8 = vld [vmem:[#allocation10 + $0x28] sm:$0xff]  ;;  %v535_v10 = vld [vmem:[#allocation10 + $0x10] sm:$0xff]  ;;  %v536_v12 = vld [vmem:[#allocation10 + $0x18] sm:$0xff] }
  0x52   :  { %663 = vmatpush.msrb.mxu3 %v596_v21  ;;  %604 = vmatpush.msrb.mxu0 %v561_v22  ;;  %v570_v9 = vld [vmem:[#allocation10 + $0x128] sm:$0xff]  ;;  %v567_v11 = vld [vmem:[#allocation10 + $0x110] sm:$0xff]  ;;  %v568_v13 = vld [vmem:[#allocation10 + $0x118] sm:$0xff] }
  0x53   :  { %624 = vmatpush.msrb.mxu1 %v593_v23  ;;  %644 = vmatpush.msrb.mxu2 %v562_v24  ;;  %v533_v14 = vld [vmem:[#allocation10] sm:$0xff]  ;;  %v534_v16 = vld [vmem:[#allocation10 + $0x8] sm:$0xff]  ;;  %v363_v20 = vld [vmem:[#allocation7] sm:$0xf] }
  0x54   :  { %664 = vmatpush.msrb.mxu3 %v594_v25  ;;  %605 = vmatpush.msrb.mxu0 %v559_v26  ;;  %v565_v15 = vld [vmem:[#allocation10 + $0x100] sm:$0xff]  ;;  %v566_v17 = vld [vmem:[#allocation10 + $0x108] sm:$0xff]  ;;  %v365_v23 = vperm.slane %v363_v20, 0  ;;  %v366_v24 = vperm.slane %v363_v20, 1 }
  0x55   :  { %625 = vmatpush.msrb.mxu1 %v591_v27  ;;  %645 = vmatpush.msrb.mxu2 %v560_v28 }
  0x56   :  { %665 = vmatpush.msrb.mxu3 %v592_v29  ;;  %606 = vmatpush.msrb.mxu0 %v557_v30 }
  0x57   :  { %626 = vmatpush.msrb.mxu1 %v589_v31  ;;  %646 = vmatpush.msrb.mxu2 %v558_v32 }
  0x58   :  { %666 = vmatpush.msrb.mxu3 %v590_v33  ;;  %607 = vmatpush.msrb.mxu0 %v555_v34  ;;  %v367_v33 = vperm.slane %v363_v20, 2  ;;  %v368_v34 = vperm.slane %v363_v20, 3  ;;  %v742_v20 = vld [vmem:[%s1574_s9 + $0x1c8] sm:$0xff] }
  0x59   :  { %627 = vmatpush.msrb.mxu1 %v587_v35  ;;  %647 = vmatpush.msrb.mxu2 %v556_v36  ;;  %v700_v35 = vld [vmem:[%s1574_s9 + $0x78] sm:$0xff] }
  0x5a   :  { %667 = vmatpush.msrb.mxu3 %v588_v37  ;;  %608 = vmatpush.msrb.mxu0 %v553_v38  ;;  %v716_v36 = vld [vmem:[%s1574_s9 + $0xf8] sm:$0xff] }
  0x5b   :  { %628 = vmatpush.msrb.mxu1 %v585_v39  ;;  %648 = vmatpush.msrb.mxu2 %v554_v40  ;;  %v732_v39 = vld [vmem:[%s1574_s9 + $0x178] sm:$0xff] }
  0x5c   :  { %668 = vmatpush.msrb.mxu3 %v586_v41  ;;  %609 = vmatpush.msrb.mxu0 %v551_v42  ;;  %v748_v40 = vld [vmem:[%s1574_s9 + $0x1f8] sm:$0xff] }
  0x5d   :  { %629 = vmatpush.msrb.mxu1 %v583_v43  ;;  %649 = vmatpush.msrb.mxu2 %v552_v44  ;;  %v699_v43 = vld [vmem:[%s1574_s9 + $0x70] sm:$0xff] }
  0x5e   :  { %669 = vmatpush.msrb.mxu3 %v584_v45  ;;  %610 = vmatpush.msrb.mxu0 %v549_v46  ;;  %v715_v44 = vld [vmem:[%s1574_s9 + $0xf0] sm:$0xff] }
  0x5f   :  { %630 = vmatpush.msrb.mxu1 %v581_v47  ;;  %650 = vmatpush.msrb.mxu2 %v550_v48  ;;  %v731_v45 = vld [vmem:[%s1574_s9 + $0x170] sm:$0xff] }
  0x60   :  { %670 = vmatpush.msrb.mxu3 %v582_v49  ;;  %611 = vmatpush.msrb.mxu0 %v547_v50  ;;  %v747_v46 = vld [vmem:[%s1574_s9 + $0x1f0] sm:$0xff]  ;;  %v698_v49 = vld [vmem:[%s1574_s9 + $0x68] sm:$0xff] }
  0x61   :  { %631 = vmatpush.msrb.mxu1 %v579_v51  ;;  %651 = vmatpush.msrb.mxu2 %v548_v52  ;;  %v714_v50 = vld [vmem:[%s1574_s9 + $0xe8] sm:$0xff] }
  0x62   :  { %671 = vmatpush.msrb.mxu3 %v580_v53  ;;  %612 = vmatpush.msrb.mxu0 %v545_v54  ;;  %v730_v51 = vld [vmem:[%s1574_s9 + $0x168] sm:$0xff] }
  0x63   :  { %632 = vmatpush.msrb.mxu1 %v577_v55  ;;  %652 = vmatpush.msrb.mxu2 %v546_v56  ;;  %v746_v52 = vld [vmem:[%s1574_s9 + $0x1e8] sm:$0xff]  ;;  %v697_v55 = vld [vmem:[%s1574_s9 + $0x60] sm:$0xff] }
  0x64   :  { %672 = vmatpush.msrb.mxu3 %v578_v57  ;;  %613 = vmatpush.msrb.mxu0 %v543_v58  ;;  %v713_v56 = vld [vmem:[%s1574_s9 + $0xe0] sm:$0xff] }
  0x65   :  { %633 = vmatpush.msrb.mxu1 %v575_v59  ;;  %653 = vmatpush.msrb.mxu2 %v544_v60  ;;  %v729_v57 = vld [vmem:[%s1574_s9 + $0x160] sm:$0xff]  ;;  %v696_v59 = vld [vmem:[%s1574_s9 + $0x58] sm:$0xff] }
  0x66   :  { %673 = vmatpush.msrb.mxu3 %v576_v61  ;;  %614 = vmatpush.msrb.mxu0 %v541_v62  ;;  %v745_v58 = vld [vmem:[%s1574_s9 + $0x1e0] sm:$0xff]  ;;  %v712_v60 = vld [vmem:[%s1574_s9 + $0xd8] sm:$0xff] }
  0x67   :  { %634 = vmatpush.msrb.mxu1 %v573_v63  ;;  %654 = vmatpush.msrb.mxu2 %v542_v0  ;;  %v728_v61 = vld [vmem:[%s1574_s9 + $0x158] sm:$0xff]  ;;  %v695_v63 = vld [vmem:[%s1574_s9 + $0x50] sm:$0xff] }
  0x68   :  { %674 = vmatpush.msrb.mxu3 %v574_v1  ;;  %615 = vmatpush.msrb.mxu0 %v539_v2  ;;  %v744_v62 = vld [vmem:[%s1574_s9 + $0x1d8] sm:$0xff]  ;;  %v711_v0 = vld [vmem:[%s1574_s9 + $0xd0] sm:$0xff]  ;;  %v694_v2 = vld [vmem:[%s1574_s9 + $0x48] sm:$0xff] }
  0x69   :  { %635 = vmatpush.msrb.mxu1 %v571_v3  ;;  %655 = vmatpush.msrb.mxu2 %v540_v4  ;;  %v727_v1 = vld [vmem:[%s1574_s9 + $0x150] sm:$0xff]  ;;  %v710_v3 = vld [vmem:[%s1574_s9 + $0xc8] sm:$0xff] }
  0x6a   :  { %675 = vmatpush.msrb.mxu3 %v572_v5  ;;  %616 = vmatpush.msrb.mxu0 %v537_v6  ;;  %v726_v4 = vld [vmem:[%s1574_s9 + $0x148] sm:$0xff]  ;;  %v693_v5 = vld [vmem:[%s1574_s9 + $0x40] sm:$0xff] }
  0x6b   :  { %636 = vmatpush.msrb.mxu1 %v569_v7  ;;  %656 = vmatpush.msrb.mxu2 %v538_v8  ;;  %v709_v6 = vld [vmem:[%s1574_s9 + $0xc0] sm:$0xff]  ;;  %v692_v8 = vld [vmem:[%s1574_s9 + $0x38] sm:$0xff] }
  0x6c   :  { %676 = vmatpush.msrb.mxu3 %v570_v9  ;;  %617 = vmatpush.msrb.mxu0 %v535_v10  ;;  %v725_v7 = vld [vmem:[%s1574_s9 + $0x140] sm:$0xff]  ;;  %v708_v9 = vld [vmem:[%s1574_s9 + $0xb8] sm:$0xff]  ;;  %v691_v10 = vld [vmem:[%s1574_s9 + $0x30] sm:$0xff] }
  0x6d   :  { %637 = vmatpush.msrb.mxu1 %v567_v11  ;;  %657 = vmatpush.msrb.mxu2 %v536_v12  ;;  %v690_v11 = vld [vmem:[%s1574_s9 + $0x28] sm:$0xff]  ;;  %v689_v12 = vld [vmem:[%s1574_s9 + $0x20] sm:$0xff] }
  0x6e   :  { %677 = vmatpush.msrb.mxu3 %v568_v13  ;;  %618 = vmatpush.msrb.mxu0 %v533_v14  ;;  %v688_v13 = vld [vmem:[%s1574_s9 + $0x18] sm:$0xff]  ;;  %v707_v14 = vld [vmem:[%s1574_s9 + $0xb0] sm:$0xff] }
  0x6f   :  { %638 = vmatpush.msrb.mxu1 %v565_v15  ;;  %658 = vmatpush.msrb.mxu2 %v534_v16  ;;  %v724_v15 = vld [vmem:[%s1574_s9 + $0x138] sm:$0xff]  ;;  %v743_v16 = vld [vmem:[%s1574_s9 + $0x1d0] sm:$0xff] }
  0x70   :  { %678 = vmatpush.msrb.mxu3 %v566_v17  ;;  %v687_v17 = vld [vmem:[%s1574_s9 + $0x10] sm:$0xff] }
  0xa3   :  { %v203_v18 = vpop.f32.mrf.mxu0 }
  0xa4   :  { %v223_v19 = vpop.f32.mrf.mxu1 }
  0xaa   :  { %v243_v21 = vpop.f32.mrf.mxu2 }
  0xab   :  { %v263_v22 = vpop.f32.mrf.mxu3  ;;  %v300_v25 = vpop.f32.mrf.mxu0 }
  0xac   :  { %v320_v26 = vpop.f32.mrf.mxu1  ;;  %v301_v27 = vadd.f32 %v300_v25, %v203_v18  ;;  %v706_v18 = vld [vmem:[%s1574_s9 + $0xa8] sm:$0xff]  ;;  %v685_v25 = vld [vmem:[%s1574_s9] sm:$0xff] }
  0xad   :  { %v321_v28 = vadd.f32 %v320_v26, %v223_v19  ;;  %v723_v19 = vld [vmem:[%s1574_s9 + $0x130] sm:$0xff]  ;;  %v704_v26 = vld [vmem:[%s1574_s9 + $0x98] sm:$0xff] }
  0xae   :  { %v373_v29 = vadd.f32 %v365_v23, %v301_v27  ;;  %v722_v23 = vld [vmem:[%s1574_s9 + $0x128] sm:$0xff]  ;;  %v721_v27 = vld [vmem:[%s1574_s9 + $0x120] sm:$0xff] }
  0xaf   :  { %v374_v30 = vadd.f32 %v366_v24, %v321_v28  ;;  %v741_v24 = vld [vmem:[%s1574_s9 + $0x1c0] sm:$0xff]  ;;  %v740_v28 = vld [vmem:[%s1574_s9 + $0x1b8] sm:$0xff] }
  0xb0   :  { %v377_v31 = vmax.f32 %v373_v29, 0.0  ;;  %v703_v29 = vld [vmem:[%s1574_s9 + $0x90] sm:$0xff] }
  0xb1   :  { %v378_v32 = vmax.f32 %v374_v30, 0.0  ;;  %v720_v30 = vld [vmem:[%s1574_s9 + $0x118] sm:$0xff] }
  0xb2   :  { %v340_v37 = vpop.f32.mrf.mxu2  ;;  %467 = vmatmul.f32.vlgmr.msra.gmra.mxu0 %v377_v31  ;;  %507 = vmatmul.f32.vlgmr.msra.gmra.mxu2 %v377_v31  ;;  %v739_v31 = vld [vmem:[%s1574_s9 + $0x1b0] sm:$0xff] }
  0xb3   :  { %v360_v38 = vpop.f32.mrf.mxu3  ;;  %487 = vmatmul.f32.vlgmr.msra.gmra.mxu1 %v378_v32  ;;  %v341_v41 = vadd.f32 %v340_v37, %v243_v21  ;;  %527 = vmatmul.f32.vlgmr.msra.gmra.mxu3 %v378_v32  ;;  %v686_v21 = vld [vmem:[%s1574_s9 + $0x8] sm:$0xff]  ;;  %v737_v37 = vld [vmem:[%s1574_s9 + $0x1a0] sm:$0xff] }
  0xb4   :  { %v361_v42 = vadd.f32 %v360_v38, %v263_v22  ;;  %753 = vmatpush.msra.mxu0 %v700_v35  ;;  %773 = vmatpush.msra.mxu1 %v716_v36  ;;  %v705_v22 = vld [vmem:[%s1574_s9 + $0xa0] sm:$0xff]  ;;  %v702_v32 = vld [vmem:[%s1574_s9 + $0x88] sm:$0xff] }
  0xb5   :  { %v375_v47 = vadd.f32 %v367_v33, %v341_v41  ;;  %793 = vmatpush.msra.mxu2 %v732_v39  ;;  %813 = vmatpush.msra.mxu3 %v748_v40  ;;  %v719_v33 = vld [vmem:[%s1574_s9 + $0x110] sm:$0xff]  ;;  %v701_v35 = vld [vmem:[%s1574_s9 + $0x80] sm:$0xff]  ;;  %v718_v36 = vld [vmem:[%s1574_s9 + $0x108] sm:$0xff] }
  0xb6   :  { %v376_v48 = vadd.f32 %v368_v34, %v361_v42  ;;  %754 = vmatpush.msra.mxu0 %v699_v43  ;;  %774 = vmatpush.msra.mxu1 %v715_v44  ;;  %v738_v34 = vld [vmem:[%s1574_s9 + $0x1a8] sm:$0xff]  ;;  %v717_v38 = vld [vmem:[%s1574_s9 + $0x100] sm:$0xff]  ;;  %v736_v39 = vld [vmem:[%s1574_s9 + $0x198] sm:$0xff] }
  0xb7   :  { %794 = vmatpush.msra.mxu2 %v731_v45  ;;  %814 = vmatpush.msra.mxu3 %v747_v46  ;;  %v379_v53 = vmax.f32 %v375_v47, 0.0  ;;  %v735_v40 = vld [vmem:[%s1574_s9 + $0x190] sm:$0xff]  ;;  %v734_v41 = vld [vmem:[%s1574_s9 + $0x188] sm:$0xff]  ;;  %v733_v42 = vld [vmem:[%s1574_s9 + $0x180] sm:$0xff] }
  0xb8   :  { %v380_v54 = vmax.f32 %v376_v48, 0.0  ;;  %755 = vmatpush.msra.mxu0 %v698_v49  ;;  %775 = vmatpush.msra.mxu1 %v714_v50  ;;  %v445_v43 = vld [vmem:[#allocation9] sm:$0x3]  ;;  %v597_v48 = vld [vmem:[#allocation12] sm:$0x3] }
  0xb9   :  { %795 = vmatpush.msra.mxu2 %v730_v51  ;;  %815 = vmatpush.msra.mxu3 %v746_v52  ;;  %v447_v44 = vperm.slane %v445_v43, 0  ;;  %v448_v50 = vperm.slane %v445_v43, 1  ;;  %v599_v52 = vperm.slane %v597_v48, 0 }
  0xba   :  { %619 = vmatmul.f32.vlgmr.msrb.gmra.mxu0 %v379_v53  ;;  %659 = vmatmul.f32.vlgmr.msrb.gmra.mxu2 %v379_v53 }
  0xbb   :  { %639 = vmatmul.f32.vlgmr.msrb.gmra.mxu1 %v380_v54  ;;  %679 = vmatmul.f32.vlgmr.msrb.gmra.mxu3 %v380_v54 }
  0xbc   :  { %756 = vmatpush.msra.mxu0 %v697_v55  ;;  %776 = vmatpush.msra.mxu1 %v713_v56 }
  0xbd   :  { %796 = vmatpush.msra.mxu2 %v729_v57  ;;  %816 = vmatpush.msra.mxu3 %v745_v58 }
  0xbe   :  { %757 = vmatpush.msra.mxu0 %v696_v59  ;;  %777 = vmatpush.msra.mxu1 %v712_v60 }
  0xbf   :  { %797 = vmatpush.msra.mxu2 %v728_v61  ;;  %817 = vmatpush.msra.mxu3 %v744_v62  ;;  %v600_v62 = vperm.slane %v597_v48, 1 }
  0xc0   :  { %758 = vmatpush.msra.mxu0 %v695_v63  ;;  %778 = vmatpush.msra.mxu1 %v711_v0 }
  0xc1   :  { %798 = vmatpush.msra.mxu2 %v727_v1  ;;  %818 = vmatpush.msra.mxu3 %v743_v16 }
  0xc2   :  { %759 = vmatpush.msra.mxu0 %v694_v2  ;;  %779 = vmatpush.msra.mxu1 %v710_v3 }
  0xc3   :  { %799 = vmatpush.msra.mxu2 %v726_v4  ;;  %819 = vmatpush.msra.mxu3 %v742_v20 }
  0xc4   :  { %760 = vmatpush.msra.mxu0 %v693_v5  ;;  %780 = vmatpush.msra.mxu1 %v709_v6  ;;  %v872_v5 = vld [vmem:[#allocation13] ss:$0 sm:$0xff] }
  0xc5   :  { %800 = vmatpush.msra.mxu2 %v725_v7  ;;  %820 = vmatpush.msra.mxu3 %v741_v24 }
  0xc6   :  { %761 = vmatpush.msra.mxu0 %v692_v8  ;;  %781 = vmatpush.msra.mxu1 %v708_v9 }
  0xc7   :  { %801 = vmatpush.msra.mxu2 %v724_v15  ;;  %821 = vmatpush.msra.mxu3 %v740_v28 }
  0xc8   :  { %762 = vmatpush.msra.mxu0 %v691_v10  ;;  %782 = vmatpush.msra.mxu1 %v707_v14 }
  0xc9   :  { %802 = vmatpush.msra.mxu2 %v723_v19  ;;  %822 = vmatpush.msra.mxu3 %v739_v31 }
  0xca   :  { %763 = vmatpush.msra.mxu0 %v690_v11  ;;  %783 = vmatpush.msra.mxu1 %v706_v18 }
  0xcb   :  { %803 = vmatpush.msra.mxu2 %v722_v23  ;;  %823 = vmatpush.msra.mxu3 %v738_v34 }
  0xcc   :  { %764 = vmatpush.msra.mxu0 %v689_v12  ;;  %784 = vmatpush.msra.mxu1 %v705_v22 }
  0xcd   :  { %804 = vmatpush.msra.mxu2 %v721_v27  ;;  %824 = vmatpush.msra.mxu3 %v737_v37 }
  0xce   :  { %765 = vmatpush.msra.mxu0 %v688_v13  ;;  %785 = vmatpush.msra.mxu1 %v704_v26 }
  0xcf   :  { %805 = vmatpush.msra.mxu2 %v720_v30  ;;  %825 = vmatpush.msra.mxu3 %v736_v39 }
  0xd0   :  { %766 = vmatpush.msra.mxu0 %v687_v17  ;;  %786 = vmatpush.msra.mxu1 %v703_v29 }
  0xd1   :  { %806 = vmatpush.msra.mxu2 %v719_v33  ;;  %826 = vmatpush.msra.mxu3 %v735_v40 }
  0xd2   :  { %767 = vmatpush.msra.mxu0 %v686_v21  ;;  %787 = vmatpush.msra.mxu1 %v702_v32 }
  0xd3   :  { %807 = vmatpush.msra.mxu2 %v718_v36  ;;  %827 = vmatpush.msra.mxu3 %v734_v41 }
  0xd4   :  { %768 = vmatpush.msra.mxu0 %v685_v25  ;;  %788 = vmatpush.msra.mxu1 %v701_v35 }
  0xd5   :  { %808 = vmatpush.msra.mxu2 %v717_v38  ;;  %828 = vmatpush.msra.mxu3 %v733_v42 }
 0x12f   :  { %v468_v45 = vpop.f32.mrf.mxu0 }
 0x130   :  { %v488_v46 = vpop.f32.mrf.mxu1  ;;  %v469_v47 = vadd.f32 %v468_v45, %v447_v44 }
 0x132   :  { %v489_v49 = vadd.f32 %v488_v46, %v469_v47 }
 0x134   :  { %v531_v51 = vmax.f32 %v489_v49, 0.0 }
 0x135   :  { %v508_v53 = vpop.f32.mrf.mxu2 }
 0x136   :  { %v528_v54 = vpop.f32.mrf.mxu3  ;;  %769 = vmatmul.f32.vlgmr.msra.gmra.mxu0 %v531_v51  ;;  %v509_v55 = vadd.f32 %v508_v53, %v448_v50 }
 0x137   :  { %v620_v56 = vpop.f32.mrf.mxu0 }
 0x138   :  { %v621_v57 = vadd.f32 %v620_v56, %v599_v52  ;;  %v529_v58 = vadd.f32 %v528_v54, %v509_v55  ;;  %v640_v59 = vpop.f32.mrf.mxu1 }
 0x13a   :  { %v641_v60 = vadd.f32 %v640_v59, %v621_v57  ;;  %v532_v61 = vmax.f32 %v529_v58, 0.0 }
 0x13c   :  { %v683_v63 = vmax.f32 %v641_v60, 0.0  ;;  %789 = vmatmul.f32.vlgmr.msra.gmra.mxu1 %v532_v61 }
 0x13d   :  { %v660_v0 = vpop.f32.mrf.mxu2 }
 0x13e   :  { %809 = vmatmul.f32.vlgmr.msra.gmra.mxu2 %v683_v63  ;;  %v661_v1 = vadd.f32 %v660_v0, %v600_v62  ;;  %v680_v2 = vpop.f32.mrf.mxu3 }
 0x140   :  { %v681_v3 = vadd.f32 %v680_v2, %v661_v1 }
 0x142   :  { %v684_v4 = vmax.f32 %v681_v3, 0.0 }
 0x144   :  { %829 = vmatmul.f32.vlgmr.msra.gmra.mxu3 %v684_v4 }
 0x1b3   :  { %v770_v6 = vpop.f32.mrf.mxu0 }
 0x1b4   :  { %v771_v8 = vadd.f32 %v872_v5, %v770_v6 }
 0x1b9   :  { %v790_v7 = vpop.f32.mrf.mxu1 }
 0x1ba   :  { %v791_v10 = vadd.f32 %v790_v7, %v771_v8 }
 0x1c1   :  { %v810_v9 = vpop.f32.mrf.mxu2 }
 0x1c2   :  { %v811_v11 = vadd.f32 %v810_v9, %v791_v10 }
 0x1c7   :  { %v830_v12 = vpop.f32.mrf.mxu3 }
 0x1c8   :  { %v831_v13 = vadd.f32 %v830_v12, %v811_v11 }
 0x1ca   :  { %834 = vst.msk [vmem:[%s1576_s11] sm:$0xff] %vm833_vm4, %v831_v13 }
 0x1cb   :  { %839 = vsyncpa [#allocation3], 1 }
 0x1cc   :  { %840 = vsyncpa [#allocation5], 1 }
 0x1cd   :  { %841 = vsyncpa [#allocation8], 1 }
 0x1ce   :  { %842 = vsyncpa [#allocation11], 1 }
 0x1cf   :  { %843 = vsyncpa [#allocation14], 1 }

</bundles_post_ra>
